<compile_context>
chip_gen: v6e
topology: v6e:2x2x1
jax: 0.10.0
libtpu: 0.0.40
codegen_flags: <defaults>
</compile_context>

<pallas_src>
import numpy as np
import jax
import jax.numpy as jnp
from jax import lax
from jax.experimental import pallas as pl
from jax.experimental.pallas import tpu as pltpu
from scipy.optimize import linear_sum_assignment

ALPHA = 0.25   # focal alpha (DETR / Mask2Former default)
GAMMA = 2.0    # focal gamma (== 2 -> implemented as jnp.square)
EPS = 1e-8


def _round_up(x, m):
    return ((x + m - 1) // m) * m


def _make_cost_kernel(w_class, w_bbox, w_giou, w_mask_over_p, w_dice, tq):
    nm_dims = (((1,), (1,)), ((), ()))           # "nc,mc->nm"

    def kernel(logits_ref, onehot_ref, obox_ref, tbox_ref, omask_ref, tmask_ref,
               tsum_ref, c_ref):
        logits = logits_ref[0].astype(jnp.float32)   # [tq, C]
        onehot = onehot_ref[0]                       # [Tp, C]  bf16 (exact 0/1)
        ob = obox_ref[0].astype(jnp.float32)         # [tq, 4]  cxcywh
        tb = tbox_ref[0].astype(jnp.float32)         # [4, Tp]  cxcywh (targets on lanes)
        om = omask_ref[0].astype(jnp.float32)        # [tq, P]  mask logits @ sampled points
        tm = tmask_ref[0]                            # [Tp, P]  bf16 target masks @ points
        tsum = tsum_ref[0]                           # [1, Tp]  f32 per-target mask sums

        # ---- focal classification cost (loss_mode == 'focal') ----
        prob = jax.nn.sigmoid(logits)
        neg_cost = (1.0 - ALPHA) * jnp.square(prob) * (-jnp.log(1.0 - prob + EPS))
        pos_cost = ALPHA * jnp.square(1.0 - prob) * (-jnp.log(prob + EPS))
        cost_class = lax.dot_general((pos_cost - neg_cost).astype(jnp.bfloat16), onehot,
                                     nm_dims, preferred_element_type=jnp.float32)   # [tq, Tp]

        # ---- L1 bbox cost (torch.cdist p=1) ----
        cost_bbox = jnp.zeros_like(cost_class)
        for c in range(4):
            cost_bbox = cost_bbox + jnp.abs(ob[:, c:c + 1] - tb[c:c + 1, :])

        # ---- generalized IoU cost (cxcywh -> xyxy), eps'd, divides on the EUP ----
        ox1 = ob[:, 0:1] - 0.5 * ob[:, 2:3]
        oy1 = ob[:, 1:2] - 0.5 * ob[:, 3:4]
        ox2 = ob[:, 0:1] + 0.5 * ob[:, 2:3]
        oy2 = ob[:, 1:2] + 0.5 * ob[:, 3:4]
        tx1 = tb[0:1, :] - 0.5 * tb[2:3, :]
        ty1 = tb[1:2, :] - 0.5 * tb[3:4, :]
        tx2 = tb[0:1, :] + 0.5 * tb[2:3, :]
        ty2 = tb[1:2, :] + 0.5 * tb[3:4, :]
        area_o = (ox2 - ox1) * (oy2 - oy1)                                    # [tq, 1]
        area_t = (tx2 - tx1) * (ty2 - ty1)                                    # [1, Tp]
        iw = jnp.maximum(jnp.minimum(ox2, tx2) - jnp.maximum(ox1, tx1), 0.0)
        ih = jnp.maximum(jnp.minimum(oy2, ty2) - jnp.maximum(oy1, ty1), 0.0)
        inter = iw * ih
        union = area_o + area_t - inter
        iou = inter * pl.reciprocal(union + EPS, approx=True)
        ew = jnp.maximum(jnp.maximum(ox2, tx2) - jnp.minimum(ox1, tx1), 0.0)
        eh = jnp.maximum(jnp.maximum(oy2, ty2) - jnp.minimum(oy1, ty1), 0.0)
        enc = ew * eh
        cost_giou = -(iou - (enc - union) * pl.reciprocal(enc + EPS, approx=True))   # [tq, Tp]

        # ---- mask + dice costs: one fused bf16 matmul against shared RHS tm ----
        # One exp + one log + one approx-recip per element instead of sigmoid+2*softplus.
        e = jnp.exp(-jnp.abs(om))                        # exp(-|x|) in (0, 1]
        r = pl.reciprocal(1.0 + e, approx=True)          # 1/(1+e)
        mprob = jnp.where(om >= 0.0, r, e * r)           # sigmoid(om)
        soft = jnp.log(1.0 + e)                          # log1p(e)
        bce_pos = jnp.maximum(-om, 0.0) + soft           # softplus(-om) = BCE vs target 1
        bce_neg = jnp.maximum(om, 0.0) + soft            # softplus(om)  = BCE vs target 0
        focal_pos = ALPHA * jnp.square(1.0 - mprob) * bce_pos
        focal_neg = (1.0 - ALPHA) * jnp.square(mprob) * bce_neg
        diff = focal_pos - focal_neg
        neg_rowsum = jnp.sum(focal_neg, axis=-1, keepdims=True)      # [tq, 1]
        mprob_rowsum = jnp.sum(mprob, axis=-1, keepdims=True)        # [tq, 1]

        # focal_pos@tm^T + focal_neg@(1-tm)^T == diff@tm^T + rowsum(focal_neg)
        lhs = jnp.concatenate([diff, mprob], axis=0).astype(jnp.bfloat16)    # [2*tq, P]
        fused = lax.dot_general(lhs, tm, nm_dims,
                                preferred_element_type=jnp.float32)          # [2*tq, Tp]
        cost_mask = fused[:tq] + neg_rowsum                                  # (/P folded in weight)
        dice_numer = 2.0 * fused[tq:]
        dice_denom = mprob_rowsum + tsum + 1.0
        cost_dice = 1.0 - (dice_numer + 1.0) * pl.reciprocal(dice_denom, approx=True)

        c_ref[0] = (w_class * cost_class + w_bbox * cost_bbox + w_giou * cost_giou
                    + w_mask_over_p * cost_mask + w_dice * cost_dice)

    return kernel


def compute_cost_matrices(logits, tgt_onehot, out_bbox, tgt_bbox,
                          out_mask_pts, tgt_mask_pts, tgt_mask_sums,
                          w_class, w_bbox, w_giou, w_mask, w_dice):
    """Returns the padded cost matrix [B, Qp, Tp]; caller slices [:, :Q, :n]."""
    B, Q, C = logits.shape
    T = tgt_onehot.shape[1]
    P = out_mask_pts.shape[-1]

    # Tiling: lane-dense T (multiple of 128); Q tiled so per-step VMEM is bounded.
    Tp = _round_up(T, 128)
    tq = 128 if Q >= 128 else _round_up(Q, 8)
    Qp = _round_up(Q, tq)
    # TODO(synk): add a P-reduction grid axis with f32 accumulators for v5e's 16 MiB
    # scoped VMEM when num_points is very large (e.g. 12544).

    f32, bf16 = jnp.float32, jnp.bfloat16
    logits_p = jnp.pad(logits.astype(f32), ((0, 0), (0, Qp - Q), (0, 0)))
    obox_p = jnp.pad(out_bbox.astype(f32), ((0, 0), (0, Qp - Q), (0, 0)),
                     constant_values=0.5)
    omask_p = jnp.pad(out_mask_pts.astype(bf16), ((0, 0), (0, Qp - Q), (0, 0)))
    onehot_p = jnp.pad(tgt_onehot.astype(bf16), ((0, 0), (0, Tp - T), (0, 0)))
    # target boxes: coords on sublanes, targets on lanes -> lane-dense broadcasts in kernel
    tbox_t = jnp.pad(jnp.swapaxes(tgt_bbox.astype(f32), 1, 2),
                     ((0, 0), (0, 0), (0, Tp - T)), constant_values=0.5)      # [B, 4, Tp]
    tmask_p = jnp.pad(tgt_mask_pts.astype(bf16), ((0, 0), (0, Tp - T), (0, 0)))
    tsum_p = jnp.pad(tgt_mask_sums.astype(f32), ((0, 0), (0, Tp - T)))[:, None, :]  # [B, 1, Tp]

    kernel = _make_cost_kernel(float(w_class), float(w_bbox), float(w_giou),
                               float(w_mask) / float(P), float(w_dice), tq)

    # Explicit VMEM budget: double-buffered input/output tiles + headroom for temporaries.
    tile_bytes = (tq * C * 4 + Tp * C * 2 + tq * 4 * 4 + 4 * Tp * 4
                  + tq * P * 2 + Tp * P * 2 + Tp * 4 + tq * Tp * 4)
    scratch_bytes = 8 * tq * P * 4 + 10 * tq * Tp * 4
    vmem_limit = int(min(max(2 * tile_bytes + scratch_bytes + (4 << 20), 16 << 20),
                         64 << 20))

    flops = 2 * B * Qp * Tp * (C + 2 * P) + 40 * B * Qp * Tp
    transcendentals = 5 * B * Qp * (P + C)
    bytes_accessed = (logits_p.size * 4 + onehot_p.size * 2 + obox_p.size * 4
                      + tbox_t.size * 4 + omask_p.size * 2 + tmask_p.size * 2
                      + tsum_p.size * 4 + B * Qp * Tp * 4)

    return pl.pallas_call(
        kernel,
        out_shape=jax.ShapeDtypeStruct((B, Qp, Tp), jnp.float32),
        grid_spec=pltpu.PrefetchScalarGridSpec(
            num_scalar_prefetch=0,
            grid=(B, Qp // tq),
            in_specs=[
                pl.BlockSpec((1, tq, C), lambda b, q: (b, q, 0)),
                pl.BlockSpec((1, Tp, C), lambda b, q: (b, 0, 0)),
                pl.BlockSpec((1, tq, 4), lambda b, q: (b, q, 0)),
                pl.BlockSpec((1, 4, Tp), lambda b, q: (b, 0, 0)),
                pl.BlockSpec((1, tq, P), lambda b, q: (b, q, 0)),
                pl.BlockSpec((1, Tp, P), lambda b, q: (b, 0, 0)),
                pl.BlockSpec((1, 1, Tp), lambda b, q: (b, 0, 0)),
            ],
            out_specs=pl.BlockSpec((1, tq, Tp), lambda b, q: (b, q, 0)),
        ),
        compiler_params=pltpu.CompilerParams(
            dimension_semantics=("parallel", "parallel"),
            vmem_limit_bytes=vmem_limit),
        cost_estimate=pl.CostEstimate(flops=int(flops),
                                      transcendentals=int(transcendentals),
                                      bytes_accessed=int(bytes_accessed)),
    )(logits_p, onehot_p, obox_p, tbox_t, omask_p, tmask_p, tsum_p)


def point_sample(masks, point_coords):
    """Plain-JAX equivalent of detectron2 point_sample (bilinear grid_sample,
    padding_mode='zeros', align_corners=False).
    masks: [N, H, W]; point_coords: [P, 2] in [0, 1], (x, y) order."""
    N, H, W = masks.shape
    x = point_coords[:, 0] * 2.0 - 1.0
    y = point_coords[:, 1] * 2.0 - 1.0
    ix = ((x + 1.0) * W - 1.0) / 2.0
    iy = ((y + 1.0) * H - 1.0) / 2.0
    ix0 = jnp.floor(ix)
    iy0 = jnp.floor(iy)
    ix1 = ix0 + 1.0
    iy1 = iy0 + 1.0
    wx1 = ix - ix0
    wx0 = 1.0 - wx1
    wy1 = iy - iy0
    wy0 = 1.0 - wy1

    def tap(iy_, ix_, w):
        valid = ((ix_ >= 0) & (ix_ <= W - 1) & (iy_ >= 0) & (iy_ <= H - 1)).astype(masks.dtype)
        ixc = jnp.clip(ix_, 0, W - 1).astype(jnp.int32)
        iyc = jnp.clip(iy_, 0, H - 1).astype(jnp.int32)
        return masks[:, iyc, ixc] * (valid * w)[None, :]

    return (tap(iy0, ix0, wy0 * wx0) + tap(iy0, ix1, wy0 * wx1)
            + tap(iy1, ix0, wy1 * wx0) + tap(iy1, ix1, wy1 * wx1))


_point_sample_batch = jax.vmap(point_sample, in_axes=(0, 0))


def reference_cost_matrices(logits, onehot, obox, tbox, ompts, tmpts,
                            w_class, w_bbox, w_giou, w_mask, w_dice):
    """Pure-JAX exact-math reference (mirrors the torch module), for validation."""
    prob = jax.nn.sigmoid(logits)
    neg = (1.0 - ALPHA) * prob ** 2 * (-jnp.log(1.0 - prob + EPS))
    pos = ALPHA * (1.0 - prob) ** 2 * (-jnp.log(prob + EPS))
    cost_class = jnp.einsum("bqc,btc->bqt", pos - neg, onehot)
    cost_bbox = jnp.abs(obox[:, :, None, :] - tbox[:, None, :, :]).sum(-1)

    def to_xyxy(b):
        cx, cy, w, h = b[..., 0], b[..., 1], b[..., 2], b[..., 3]
        return jnp.stack([cx - 0.5 * w, cy - 0.5 * h, cx + 0.5 * w, cy + 0.5 * h], -1)
    o = to_xyxy(obox)[:, :, None, :]
    t = to_xyxy(tbox)[:, None, :, :]
    area_o = (o[..., 2] - o[..., 0]) * (o[..., 3] - o[..., 1])
    area_t = (t[..., 2] - t[..., 0]) * (t[..., 3] - t[..., 1])
    iw = jnp.maximum(jnp.minimum(o[..., 2], t[..., 2]) - jnp.maximum(o[..., 0], t[..., 0]), 0.0)
    ih = jnp.maximum(jnp.minimum(o[..., 3], t[..., 3]) - jnp.maximum(o[..., 1], t[..., 1]), 0.0)
    inter = iw * ih
    union = area_o + area_t - inter
    iou = inter / (union + EPS)
    ew = jnp.maximum(jnp.maximum(o[..., 2], t[..., 2]) - jnp.minimum(o[..., 0], t[..., 0]), 0.0)
    eh = jnp.maximum(jnp.maximum(o[..., 3], t[..., 3]) - jnp.minimum(o[..., 1], t[..., 1]), 0.0)
    enc = ew * eh
    cost_giou = -(iou - (enc - union) / (enc + EPS))

    P = ompts.shape[-1]
    mprob = jax.nn.sigmoid(ompts)
    fpos = ALPHA * (1.0 - mprob) ** 2 * jax.nn.softplus(-ompts)
    fneg = (1.0 - ALPHA) * mprob ** 2 * jax.nn.softplus(ompts)
    cost_mask = (jnp.einsum("bqp,btp->bqt", fpos, tmpts)
                 + jnp.einsum("bqp,btp->bqt", fneg, 1.0 - tmpts)) / P
    numer = 2.0 * jnp.einsum("bqp,btp->bqt", mprob, tmpts)
    denom = mprob.sum(-1)[:, :, None] + tmpts.sum(-1)[:, None, :]
    cost_dice = 1.0 - (numer + 1.0) / (denom + 1.0)
    return (w_class * cost_class + w_bbox * cost_bbox + w_giou * cost_giou
            + w_mask * cost_mask + w_dice * cost_dice)


class HungarianMatcherWithMask:
    def __init__(self, cost_class=1.0, cost_bbox=1.0, cost_giou=1.0, cost_dice=1.0,
                 cost_mask=1.0, num_points=0, loss_mode="focal"):
        assert cost_class != 0 or cost_bbox != 0 or cost_giou != 0 or cost_mask != 0 or cost_dice != 0
        assert loss_mode in ("ce", "bce", "focal")
        if loss_mode != "focal":
            # TODO(synk): only the default 'focal' loss_mode is implemented in the Pallas kernel.
            raise NotImplementedError("only loss_mode='focal' is implemented")
        self.cost_class = cost_class
        self.cost_bbox = cost_bbox
        self.cost_giou = cost_giou
        self.cost_dice = cost_dice
        self.cost_mask = cost_mask
        self.num_points = int(num_points)
        self.loss_mode = loss_mode

    def _prepare(self, outputs, targets, key):
        pred_logits = outputs["pred_logits"]
        pred_boxes = outputs["pred_boxes"]
        pred_masks = outputs["pred_masks"]
        if outputs.get("padding_masks") is not None:
            # TODO(synk): padding-mask-aware point_sample (input_mask=...) not implemented.
            raise NotImplementedError
        B, Q, C = pred_logits.shape
        counts = [int(t["labels"].shape[0]) for t in targets]
        T = max(counts)

        labels_p = jnp.stack([jnp.pad(t["labels"].astype(jnp.int32), (0, T - n),
                                      constant_values=C)
                              for t, n in zip(targets, counts)])              # [B, T]
        tboxes = jnp.stack([jnp.pad(t["boxes"].astype(jnp.float32), ((0, T - n), (0, 0)),
                                    constant_values=0.5)
                            for t, n in zip(targets, counts)])                # [B, T, 4]
        tmasks = jnp.stack([jnp.pad(t["masks"].astype(jnp.float32),
                                    ((0, T - n), (0, 0), (0, 0)))
                            for t, n in zip(targets, counts)])                # [B, T, H, W]

        tgt_onehot = jax.nn.one_hot(labels_p, C, dtype=jnp.float32)           # pad rows -> zeros
        # per-image random sampling points (same points for tgt & pred masks of each image)
        coords = jax.random.uniform(key, (B, self.num_points, 2), dtype=jnp.float32)
        tgt_mpts = _point_sample_batch(tmasks, coords)                        # [B, T, P]
        out_mpts = _point_sample_batch(pred_masks.astype(jnp.float32), coords)  # [B, Q, P]
        tgt_sums = jnp.sum(tgt_mpts, axis=-1)                                 # [B, T]
        return (pred_logits.astype(jnp.float32), tgt_onehot,
                pred_boxes.astype(jnp.float32), tboxes,
                out_mpts, tgt_mpts, tgt_sums, counts)

    def __call__(self, outputs, targets, key):
        (logits, onehot, obox, tbox, ompts, tmpts, tsums, counts) = \
            self._prepare(outputs, targets, key)
        Cmat = compute_cost_matrices(
            logits, onehot, obox, tbox, ompts, tmpts, tsums,
            self.cost_class, self.cost_bbox, self.cost_giou,
            self.cost_mask, self.cost_dice)
        Q = logits.shape[1]
        Cnp = np.asarray(jax.block_until_ready(Cmat))
        indices = []
        for i, n in enumerate(counts):
            # Hungarian on host (sequential augmenting-path algorithm, no Pallas equivalent)
            r, c = linear_sum_assignment(Cnp[i, :Q, :n])
            indices.append((np.asarray(r, dtype=np.int64), np.asarray(c, dtype=np.int64)))
        return indices


if __name__ == "__main__":
    key = jax.random.PRNGKey(0)
    B, Q, C, H, W, P = 2, 8, 16, 16, 16, 32
    k1, k2, k3, k4, kpt = jax.random.split(key, 5)

    pred_logits = jax.random.normal(k1, (B, Q, C), dtype=jnp.float32)
    pred_boxes = jax.nn.sigmoid(jax.random.normal(k2, (B, Q, 4), dtype=jnp.float32))
    pred_masks = jax.random.normal(k3, (B, Q, H, W), dtype=jnp.float32)

    counts = [8, 6]
    targets = []
    for i in range(B):
        ki = jax.random.fold_in(k4, i)
        ka, kb, kc = jax.random.split(ki, 3)
        n = counts[i]
        targets.append({
            "labels": jax.random.randint(ka, (n,), 0, C),
            "boxes": jax.nn.sigmoid(jax.random.normal(kb, (n, 4), dtype=jnp.float32)),
            "masks": (jax.random.uniform(kc, (n, H, W)) > 0.5).astype(jnp.float32),
        })

    matcher = HungarianMatcherWithMask(cost_class=2.0, cost_bbox=5.0, cost_giou=2.0,
                                       cost_dice=5.0, cost_mask=5.0, num_points=P,
                                       loss_mode="focal")
    outputs = {"pred_logits": pred_logits, "pred_boxes": pred_boxes,
               "pred_masks": pred_masks, "padding_masks": None}

    # --- run kernel once + validate against exact-math JAX reference ---
    logits, onehot, obox, tbox, ompts, tmpts, tsums, cts = \
        matcher._prepare(outputs, targets, kpt)
    Cmat = compute_cost_matrices(logits, onehot, obox, tbox, ompts, tmpts, tsums,
                                 2.0, 5.0, 2.0, 5.0, 5.0)
    Cmat = np.asarray(jax.block_until_ready(Cmat))
    Cref = np.asarray(reference_cost_matrices(logits, onehot, obox, tbox, ompts, tmpts,
                                              2.0, 5.0, 2.0, 5.0, 5.0))
    T = onehot.shape[1]
    assert np.isfinite(Cmat).all()
    np.testing.assert_allclose(Cmat[:, :Q, :T], Cref, rtol=5e-2, atol=1.5e-1)

    # --- full matcher (kernel + host Hungarian) ---
    indices = matcher(outputs, targets, kpt)
    for (ri, ci), n in zip(indices, counts):
        assert len(ri) == len(ci) == min(Q, n)
        assert np.isfinite(ri).all() and np.isfinite(ci).all()
    print("KERNEL_OK")
</pallas_src>

<mosaic_0001>
module attributes {stable_mosaic.version = 11 : i64} {
  func.func @kernel(%arg0: i32, %arg1: i32, %arg2: memref<1x8x16xf32, #tpu.memory_space<vmem>>, %arg3: memref<1x128x16xbf16, #tpu.memory_space<vmem>>, %arg4: memref<1x8x4xf32, #tpu.memory_space<vmem>>, %arg5: memref<1x4x128xf32, #tpu.memory_space<vmem>>, %arg6: memref<1x8x32xbf16, #tpu.memory_space<vmem>>, %arg7: memref<1x128x32xbf16, #tpu.memory_space<vmem>>, %arg8: memref<1x1x128xf32, #tpu.memory_space<vmem>>, %arg9: memref<1x8x128xf32, #tpu.memory_space<vmem>>) attributes {dimension_semantics = [#tpu.dimension_semantics<parallel>, #tpu.dimension_semantics<parallel>], iteration_bounds = array<i64: 2, 1>, scalar_prefetch = 0 : i64, scratch_operands = 0 : i64, tpu.core_type = #tpu.core_type<tc>, window_params = [{transform_indices = @transform_0, window_bounds = array<i64: 1, 8, 16>}, {transform_indices = @transform_1, window_bounds = array<i64: 1, 128, 16>}, {transform_indices = @transform_2, window_bounds = array<i64: 1, 8, 4>}, {transform_indices = @transform_3, window_bounds = array<i64: 1, 4, 128>}, {transform_indices = @transform_4, window_bounds = array<i64: 1, 8, 32>}, {transform_indices = @transform_5, window_bounds = array<i64: 1, 128, 32>}, {transform_indices = @transform_6, window_bounds = array<i64: 1, 1, 128>}, {transform_indices = @transform_7, window_bounds = array<i64: 1, 8, 128>}]} {
    %c0 = arith.constant 0 : index
    %c0_0 = arith.constant 0 : index
    %c0_1 = arith.constant 0 : index
    %0 = vector.load %arg2[%c0, %c0_0, %c0_1] : memref<1x8x16xf32, #tpu.memory_space<vmem>>, vector<1x8x16xf32>
    %1 = vector.shape_cast %0 : vector<1x8x16xf32> to vector<8x16xf32>
    %c0_2 = arith.constant 0 : index
    %c0_3 = arith.constant 0 : index
    %c0_4 = arith.constant 0 : index
    %2 = vector.load %arg3[%c0_2, %c0_3, %c0_4] : memref<1x128x16xbf16, #tpu.memory_space<vmem>>, vector<1x128x16xbf16>
    %3 = vector.shape_cast %2 : vector<1x128x16xbf16> to vector<128x16xbf16>
    %c0_5 = arith.constant 0 : index
    %c0_6 = arith.constant 0 : index
    %c0_7 = arith.constant 0 : index
    %4 = vector.load %arg4[%c0_5, %c0_6, %c0_7] : memref<1x8x4xf32, #tpu.memory_space<vmem>>, vector<1x8x4xf32>
    %5 = vector.shape_cast %4 : vector<1x8x4xf32> to vector<8x4xf32>
    %c0_8 = arith.constant 0 : index
    %c0_9 = arith.constant 0 : index
    %c0_10 = arith.constant 0 : index
    %6 = vector.load %arg5[%c0_8, %c0_9, %c0_10] : memref<1x4x128xf32, #tpu.memory_space<vmem>>, vector<1x4x128xf32>
    %7 = vector.shape_cast %6 : vector<1x4x128xf32> to vector<4x128xf32>
    %c0_11 = arith.constant 0 : index
    %c0_12 = arith.constant 0 : index
    %c0_13 = arith.constant 0 : index
    %8 = vector.load %arg6[%c0_11, %c0_12, %c0_13] : memref<1x8x32xbf16, #tpu.memory_space<vmem>>, vector<1x8x32xbf16>
    %9 = vector.shape_cast %8 : vector<1x8x32xbf16> to vector<8x32xbf16>
    %10 = arith.extf %9 : vector<8x32xbf16> to vector<8x32xf32>
    %c0_14 = arith.constant 0 : index
    %c0_15 = arith.constant 0 : index
    %c0_16 = arith.constant 0 : index
    %11 = vector.load %arg7[%c0_14, %c0_15, %c0_16] : memref<1x128x32xbf16, #tpu.memory_space<vmem>>, vector<1x128x32xbf16>
    %12 = vector.shape_cast %11 : vector<1x128x32xbf16> to vector<128x32xbf16>
    %c0_17 = arith.constant 0 : index
    %c0_18 = arith.constant 0 : index
    %c0_19 = arith.constant 0 : index
    %13 = vector.load %arg8[%c0_17, %c0_18, %c0_19] : memref<1x1x128xf32, #tpu.memory_space<vmem>>, vector<1x1x128xf32>
    %14 = vector.shape_cast %13 : vector<1x1x128xf32> to vector<1x128xf32>
    %15 = arith.negf %1 : vector<8x16xf32>
    %16 = math.exp %15 : vector<8x16xf32>
    %cst = arith.constant 1.000000e+00 : f32
    %17 = vector.broadcast %cst : f32 to vector<8x16xf32>
    %18 = arith.addf %17, %16 : vector<8x16xf32>
    %19 = arith.divf %17, %18 : vector<8x16xf32>
    %20 = arith.mulf %19, %19 : vector<8x16xf32>
    %cst_20 = arith.constant 7.500000e-01 : f32
    %21 = vector.broadcast %cst_20 : f32 to vector<8x16xf32>
    %22 = arith.mulf %21, %20 : vector<8x16xf32>
    %cst_21 = arith.constant 1.000000e+00 : f32
    %23 = vector.broadcast %cst_21 : f32 to vector<8x16xf32>
    %24 = arith.subf %23, %19 : vector<8x16xf32>
    %cst_22 = arith.constant 9.99999993E-9 : f32
    %25 = vector.broadcast %cst_22 : f32 to vector<8x16xf32>
    %26 = arith.addf %24, %25 : vector<8x16xf32>
    %27 = math.log %26 : vector<8x16xf32>
    %cst_23 = arith.constant 0.000000e+00 : f32
    %28 = vector.broadcast %cst_23 : f32 to vector<8x16xf32>
    %29 = arith.subf %28, %27 : vector<8x16xf32>
    %30 = arith.mulf %22, %29 : vector<8x16xf32>
    %cst_24 = arith.constant 1.000000e+00 : f32
    %31 = vector.broadcast %cst_24 : f32 to vector<8x16xf32>
    %32 = arith.subf %31, %19 : vector<8x16xf32>
    %33 = arith.mulf %32, %32 : vector<8x16xf32>
    %cst_25 = arith.constant 2.500000e-01 : f32
    %34 = vector.broadcast %cst_25 : f32 to vector<8x16xf32>
    %35 = arith.mulf %34, %33 : vector<8x16xf32>
    %cst_26 = arith.constant 9.99999993E-9 : f32
    %36 = vector.broadcast %cst_26 : f32 to vector<8x16xf32>
    %37 = arith.addf %19, %36 : vector<8x16xf32>
    %38 = math.log %37 : vector<8x16xf32>
    %cst_27 = arith.constant 0.000000e+00 : f32
    %39 = vector.broadcast %cst_27 : f32 to vector<8x16xf32>
    %40 = arith.subf %39, %38 : vector<8x16xf32>
    %41 = arith.mulf %35, %40 : vector<8x16xf32>
    %42 = arith.subf %41, %30 : vector<8x16xf32>
    %43 = arith.truncf %42 : vector<8x16xf32> to vector<8x16xbf16>
    %cst_28 = arith.constant dense<0.000000e+00> : vector<8x128xf32>
    %44 = tpu.matmul %43, %3, %cst_28 {dimension_numbers = #tpu.dot_dimension_numbers<[1], [1], [0], [0], [0, 0, 1, 0], [], []>} : vector<8x16xbf16>, vector<128x16xbf16>, vector<8x128xf32> -> vector<8x128xf32>
    %cst_29 = arith.constant 0.000000e+00 : f32
    %45 = vector.broadcast %cst_29 : f32 to vector<8x128xf32>
    %46 = vector.extract_strided_slice %5 {offsets = [0, 0], sizes = [8, 1], strides = [1, 1]} : vector<8x4xf32> to vector<8x1xf32>
    %47 = vector.extract_strided_slice %7 {offsets = [0, 0], sizes = [1, 128], strides = [1, 1]} : vector<4x128xf32> to vector<1x128xf32>
    %48 = vector.broadcast %46 : vector<8x1xf32> to vector<8x128xf32>
    %49 = vector.broadcast %47 : vector<1x128xf32> to vector<8x128xf32>
    %50 = arith.subf %48, %49 : vector<8x128xf32>
    %51 = math.absf %50 : vector<8x128xf32>
    %52 = arith.addf %45, %51 : vector<8x128xf32>
    %53 = vector.extract_strided_slice %5 {offsets = [0, 1], sizes = [8, 1], strides = [1, 1]} : vector<8x4xf32> to vector<8x1xf32>
    %54 = vector.extract_strided_slice %7 {offsets = [1, 0], sizes = [1, 128], strides = [1, 1]} : vector<4x128xf32> to vector<1x128xf32>
    %55 = vector.broadcast %53 : vector<8x1xf32> to vector<8x128xf32>
    %56 = vector.broadcast %54 : vector<1x128xf32> to vector<8x128xf32>
    %57 = arith.subf %55, %56 : vector<8x128xf32>
    %58 = math.absf %57 : vector<8x128xf32>
    %59 = arith.addf %52, %58 : vector<8x128xf32>
    %60 = vector.extract_strided_slice %5 {offsets = [0, 2], sizes = [8, 1], strides = [1, 1]} : vector<8x4xf32> to vector<8x1xf32>
    %61 = vector.extract_strided_slice %7 {offsets = [2, 0], sizes = [1, 128], strides = [1, 1]} : vector<4x128xf32> to vector<1x128xf32>
    %62 = vector.broadcast %60 : vector<8x1xf32> to vector<8x128xf32>
    %63 = vector.broadcast %61 : vector<1x128xf32> to vector<8x128xf32>
    %64 = arith.subf %62, %63 : vector<8x128xf32>
    %65 = math.absf %64 : vector<8x128xf32>
    %66 = arith.addf %59, %65 : vector<8x128xf32>
    %67 = vector.extract_strided_slice %5 {offsets = [0, 3], sizes = [8, 1], strides = [1, 1]} : vector<8x4xf32> to vector<8x1xf32>
    %68 = vector.extract_strided_slice %7 {offsets = [3, 0], sizes = [1, 128], strides = [1, 1]} : vector<4x128xf32> to vector<1x128xf32>
    %69 = vector.broadcast %67 : vector<8x1xf32> to vector<8x128xf32>
    %70 = vector.broadcast %68 : vector<1x128xf32> to vector<8x128xf32>
    %71 = arith.subf %69, %70 : vector<8x128xf32>
    %72 = math.absf %71 : vector<8x128xf32>
    %73 = arith.addf %66, %72 : vector<8x128xf32>
    %74 = vector.extract_strided_slice %5 {offsets = [0, 0], sizes = [8, 1], strides = [1, 1]} : vector<8x4xf32> to vector<8x1xf32>
    %75 = vector.extract_strided_slice %5 {offsets = [0, 2], sizes = [8, 1], strides = [1, 1]} : vector<8x4xf32> to vector<8x1xf32>
    %cst_30 = arith.constant 5.000000e-01 : f32
    %76 = vector.broadcast %cst_30 : f32 to vector<8x1xf32>
    %77 = arith.mulf %76, %75 : vector<8x1xf32>
    %78 = arith.subf %74, %77 : vector<8x1xf32>
    %79 = vector.extract_strided_slice %5 {offsets = [0, 1], sizes = [8, 1], strides = [1, 1]} : vector<8x4xf32> to vector<8x1xf32>
    %80 = vector.extract_strided_slice %5 {offsets = [0, 3], sizes = [8, 1], strides = [1, 1]} : vector<8x4xf32> to vector<8x1xf32>
    %cst_31 = arith.constant 5.000000e-01 : f32
    %81 = vector.broadcast %cst_31 : f32 to vector<8x1xf32>
    %82 = arith.mulf %81, %80 : vector<8x1xf32>
    %83 = arith.subf %79, %82 : vector<8x1xf32>
    %84 = vector.extract_strided_slice %5 {offsets = [0, 0], sizes = [8, 1], strides = [1, 1]} : vector<8x4xf32> to vector<8x1xf32>
    %85 = vector.extract_strided_slice %5 {offsets = [0, 2], sizes = [8, 1], strides = [1, 1]} : vector<8x4xf32> to vector<8x1xf32>
    %cst_32 = arith.constant 5.000000e-01 : f32
    %86 = vector.broadcast %cst_32 : f32 to vector<8x1xf32>
    %87 = arith.mulf %86, %85 : vector<8x1xf32>
    %88 = arith.addf %84, %87 : vector<8x1xf32>
    %89 = vector.extract_strided_slice %5 {offsets = [0, 1], sizes = [8, 1], strides = [1, 1]} : vector<8x4xf32> to vector<8x1xf32>
    %90 = vector.extract_strided_slice %5 {offsets = [0, 3], sizes = [8, 1], strides = [1, 1]} : vector<8x4xf32> to vector<8x1xf32>
    %cst_33 = arith.constant 5.000000e-01 : f32
    %91 = vector.broadcast %cst_33 : f32 to vector<8x1xf32>
    %92 = arith.mulf %91, %90 : vector<8x1xf32>
    %93 = arith.addf %89, %92 : vector<8x1xf32>
    %94 = vector.extract_strided_slice %7 {offsets = [0, 0], sizes = [1, 128], strides = [1, 1]} : vector<4x128xf32> to vector<1x128xf32>
    %95 = vector.extract_strided_slice %7 {offsets = [2, 0], sizes = [1, 128], strides = [1, 1]} : vector<4x128xf32> to vector<1x128xf32>
    %cst_34 = arith.constant 5.000000e-01 : f32
    %96 = vector.broadcast %cst_34 : f32 to vector<1x128xf32>
    %97 = arith.mulf %96, %95 : vector<1x128xf32>
    %98 = arith.subf %94, %97 : vector<1x128xf32>
    %99 = vector.extract_strided_slice %7 {offsets = [1, 0], sizes = [1, 128], strides = [1, 1]} : vector<4x128xf32> to vector<1x128xf32>
    %100 = vector.extract_strided_slice %7 {offsets = [3, 0], sizes = [1, 128], strides = [1, 1]} : vector<4x128xf32> to vector<1x128xf32>
    %cst_35 = arith.constant 5.000000e-01 : f32
    %101 = vector.broadcast %cst_35 : f32 to vector<1x128xf32>
    %102 = arith.mulf %101, %100 : vector<1x128xf32>
    %103 = arith.subf %99, %102 : vector<1x128xf32>
    %104 = vector.extract_strided_slice %7 {offsets = [0, 0], sizes = [1, 128], strides = [1, 1]} : vector<4x128xf32> to vector<1x128xf32>
    %105 = vector.extract_strided_slice %7 {offsets = [2, 0], sizes = [1, 128], strides = [1, 1]} : vector<4x128xf32> to vector<1x128xf32>
    %cst_36 = arith.constant 5.000000e-01 : f32
    %106 = vector.broadcast %cst_36 : f32 to vector<1x128xf32>
    %107 = arith.mulf %106, %105 : vector<1x128xf32>
    %108 = arith.addf %104, %107 : vector<1x128xf32>
    %109 = vector.extract_strided_slice %7 {offsets = [1, 0], sizes = [1, 128], strides = [1, 1]} : vector<4x128xf32> to vector<1x128xf32>
    %110 = vector.extract_strided_slice %7 {offsets = [3, 0], sizes = [1, 128], strides = [1, 1]} : vector<4x128xf32> to vector<1x128xf32>
    %cst_37 = arith.constant 5.000000e-01 : f32
    %111 = vector.broadcast %cst_37 : f32 to vector<1x128xf32>
    %112 = arith.mulf %111, %110 : vector<1x128xf32>
    %113 = arith.addf %109, %112 : vector<1x128xf32>
    %114 = arith.subf %88, %78 : vector<8x1xf32>
    %115 = arith.subf %93, %83 : vector<8x1xf32>
    %116 = arith.mulf %114, %115 : vector<8x1xf32>
    %117 = arith.subf %108, %98 : vector<1x128xf32>
    %118 = arith.subf %113, %103 : vector<1x128xf32>
    %119 = arith.mulf %117, %118 : vector<1x128xf32>
    %120 = vector.broadcast %88 : vector<8x1xf32> to vector<8x128xf32>
    %121 = vector.broadcast %108 : vector<1x128xf32> to vector<8x128xf32>
    %122 = arith.minimumf %120, %121 : vector<8x128xf32>
    %123 = vector.broadcast %78 : vector<8x1xf32> to vector<8x128xf32>
    %124 = vector.broadcast %98 : vector<1x128xf32> to vector<8x128xf32>
    %125 = arith.maximumf %123, %124 : vector<8x128xf32>
    %126 = arith.subf %122, %125 : vector<8x128xf32>
    %cst_38 = arith.constant 0.000000e+00 : f32
    %127 = vector.broadcast %cst_38 : f32 to vector<8x128xf32>
    %128 = arith.maximumf %126, %127 : vector<8x128xf32>
    %129 = vector.broadcast %93 : vector<8x1xf32> to vector<8x128xf32>
    %130 = vector.broadcast %113 : vector<1x128xf32> to vector<8x128xf32>
    %131 = arith.minimumf %129, %130 : vector<8x128xf32>
    %132 = vector.broadcast %83 : vector<8x1xf32> to vector<8x128xf32>
    %133 = vector.broadcast %103 : vector<1x128xf32> to vector<8x128xf32>
    %134 = arith.maximumf %132, %133 : vector<8x128xf32>
    %135 = arith.subf %131, %134 : vector<8x128xf32>
    %cst_39 = arith.constant 0.000000e+00 : f32
    %136 = vector.broadcast %cst_39 : f32 to vector<8x128xf32>
    %137 = arith.maximumf %135, %136 : vector<8x128xf32>
    %138 = arith.mulf %128, %137 : vector<8x128xf32>
    %139 = vector.broadcast %116 : vector<8x1xf32> to vector<8x128xf32>
    %140 = vector.broadcast %119 : vector<1x128xf32> to vector<8x128xf32>
    %141 = arith.addf %139, %140 : vector<8x128xf32>
    %142 = arith.subf %141, %138 : vector<8x128xf32>
    %cst_40 = arith.constant 9.99999993E-9 : f32
    %143 = vector.broadcast %cst_40 : f32 to vector<8x128xf32>
    %144 = arith.addf %142, %143 : vector<8x128xf32>
    %145 = tpu.reciprocal %144 {approx = true} : vector<8x128xf32> -> vector<8x128xf32>
    %146 = arith.mulf %138, %145 : vector<8x128xf32>
    %147 = vector.broadcast %88 : vector<8x1xf32> to vector<8x128xf32>
    %148 = vector.broadcast %108 : vector<1x128xf32> to vector<8x128xf32>
    %149 = arith.maximumf %147, %148 : vector<8x128xf32>
    %150 = vector.broadcast %78 : vector<8x1xf32> to vector<8x128xf32>
    %151 = vector.broadcast %98 : vector<1x128xf32> to vector<8x128xf32>
    %152 = arith.minimumf %150, %151 : vector<8x128xf32>
    %153 = arith.subf %149, %152 : vector<8x128xf32>
    %cst_41 = arith.constant 0.000000e+00 : f32
    %154 = vector.broadcast %cst_41 : f32 to vector<8x128xf32>
    %155 = arith.maximumf %153, %154 : vector<8x128xf32>
    %156 = vector.broadcast %93 : vector<8x1xf32> to vector<8x128xf32>
    %157 = vector.broadcast %113 : vector<1x128xf32> to vector<8x128xf32>
    %158 = arith.maximumf %156, %157 : vector<8x128xf32>
    %159 = vector.broadcast %83 : vector<8x1xf32> to vector<8x128xf32>
    %160 = vector.broadcast %103 : vector<1x128xf32> to vector<8x128xf32>
    %161 = arith.minimumf %159, %160 : vector<8x128xf32>
    %162 = arith.subf %158, %161 : vector<8x128xf32>
    %cst_42 = arith.constant 0.000000e+00 : f32
    %163 = vector.broadcast %cst_42 : f32 to vector<8x128xf32>
    %164 = arith.maximumf %162, %163 : vector<8x128xf32>
    %165 = arith.mulf %155, %164 : vector<8x128xf32>
    %166 = arith.subf %165, %142 : vector<8x128xf32>
    %cst_43 = arith.constant 9.99999993E-9 : f32
    %167 = vector.broadcast %cst_43 : f32 to vector<8x128xf32>
    %168 = arith.addf %165, %167 : vector<8x128xf32>
    %169 = tpu.reciprocal %168 {approx = true} : vector<8x128xf32> -> vector<8x128xf32>
    %170 = arith.mulf %166, %169 : vector<8x128xf32>
    %171 = arith.subf %146, %170 : vector<8x128xf32>
    %cst_44 = arith.constant 0.000000e+00 : f32
    %172 = vector.broadcast %cst_44 : f32 to vector<8x128xf32>
    %173 = arith.subf %172, %171 : vector<8x128xf32>
    %174 = math.absf %10 : vector<8x32xf32>
    %cst_45 = arith.constant 0.000000e+00 : f32
    %175 = vector.broadcast %cst_45 : f32 to vector<8x32xf32>
    %176 = arith.subf %175, %174 : vector<8x32xf32>
    %177 = math.exp %176 : vector<8x32xf32>
    %cst_46 = arith.constant 1.000000e+00 : f32
    %178 = vector.broadcast %cst_46 : f32 to vector<8x32xf32>
    %179 = arith.addf %178, %177 : vector<8x32xf32>
    %180 = tpu.reciprocal %179 {approx = true} : vector<8x32xf32> -> vector<8x32xf32>
    %cst_47 = arith.constant 0.000000e+00 : f32
    %181 = vector.broadcast %cst_47 : f32 to vector<8x32xf32>
    %182 = arith.cmpf oge, %10, %181 : vector<8x32xf32>
    %183 = arith.mulf %177, %180 : vector<8x32xf32>
    %184 = arith.select %182, %180, %183 : vector<8x32xi1>, vector<8x32xf32>
    %cst_48 = arith.constant 1.000000e+00 : f32
    %185 = vector.broadcast %cst_48 : f32 to vector<8x32xf32>
    %186 = arith.addf %185, %177 : vector<8x32xf32>
    %187 = math.log %186 : vector<8x32xf32>
    %cst_49 = arith.constant 0.000000e+00 : f32
    %188 = vector.broadcast %cst_49 : f32 to vector<8x32xf32>
    %189 = arith.subf %188, %10 : vector<8x32xf32>
    %cst_50 = arith.constant 0.000000e+00 : f32
    %190 = vector.broadcast %cst_50 : f32 to vector<8x32xf32>
    %191 = arith.maximumf %189, %190 : vector<8x32xf32>
    %192 = arith.addf %191, %187 : vector<8x32xf32>
    %cst_51 = arith.constant 0.000000e+00 : f32
    %193 = vector.broadcast %cst_51 : f32 to vector<8x32xf32>
    %194 = arith.maximumf %10, %193 : vector<8x32xf32>
    %195 = arith.addf %194, %187 : vector<8x32xf32>
    %cst_52 = arith.constant 1.000000e+00 : f32
    %196 = vector.broadcast %cst_52 : f32 to vector<8x32xf32>
    %197 = arith.subf %196, %184 : vector<8x32xf32>
    %198 = arith.mulf %197, %197 : vector<8x32xf32>
    %cst_53 = arith.constant 2.500000e-01 : f32
    %199 = vector.broadcast %cst_53 : f32 to vector<8x32xf32>
    %200 = arith.mulf %199, %198 : vector<8x32xf32>
    %201 = arith.mulf %200, %192 : vector<8x32xf32>
    %202 = arith.mulf %184, %184 : vector<8x32xf32>
    %cst_54 = arith.constant 7.500000e-01 : f32
    %203 = vector.broadcast %cst_54 : f32 to vector<8x32xf32>
    %204 = arith.mulf %203, %202 : vector<8x32xf32>
    %205 = arith.mulf %204, %195 : vector<8x32xf32>
    %206 = arith.subf %201, %205 : vector<8x32xf32>
    %cst_55 = arith.constant dense<0.000000e+00> : vector<8xf32>
    %207 = vector.multi_reduction <add>, %205, %cst_55 [1] : vector<8x32xf32> to vector<8xf32>
    %208 = vector.shape_cast %207 : vector<8xf32> to vector<8x1xf32>
    %cst_56 = arith.constant dense<0.000000e+00> : vector<8xf32>
    %209 = vector.multi_reduction <add>, %184, %cst_56 [1] : vector<8x32xf32> to vector<8xf32>
    %210 = vector.shape_cast %209 : vector<8xf32> to vector<8x1xf32>
    %211 = tpu.concatenate %206, %184 in 0 : vector<8x32xf32>, vector<8x32xf32> -> vector<16x32xf32>
    %212 = arith.truncf %211 : vector<16x32xf32> to vector<16x32xbf16>
    %cst_57 = arith.constant dense<0.000000e+00> : vector<16x128xf32>
    %213 = tpu.matmul %212, %12, %cst_57 {dimension_numbers = #tpu.dot_dimension_numbers<[1], [1], [0], [0], [0, 0, 1, 0], [], []>} : vector<16x32xbf16>, vector<128x32xbf16>, vector<16x128xf32> -> vector<16x128xf32>
    %214 = vector.extract_strided_slice %213 {offsets = [0, 0], sizes = [8, 128], strides = [1, 1]} : vector<16x128xf32> to vector<8x128xf32>
    %215 = vector.broadcast %208 : vector<8x1xf32> to vector<8x128xf32>
    %216 = arith.addf %214, %215 : vector<8x128xf32>
    %217 = vector.extract_strided_slice %213 {offsets = [8, 0], sizes = [8, 128], strides = [1, 1]} : vector<16x128xf32> to vector<8x128xf32>
    %cst_58 = arith.constant 2.000000e+00 : f32
    %218 = vector.broadcast %cst_58 : f32 to vector<8x128xf32>
    %219 = arith.mulf %218, %217 : vector<8x128xf32>
    %220 = vector.broadcast %210 : vector<8x1xf32> to vector<8x128xf32>
    %221 = vector.broadcast %14 : vector<1x128xf32> to vector<8x128xf32>
    %222 = arith.addf %220, %221 : vector<8x128xf32>
    %cst_59 = arith.constant 1.000000e+00 : f32
    %223 = vector.broadcast %cst_59 : f32 to vector<8x128xf32>
    %224 = arith.addf %222, %223 : vector<8x128xf32>
    %cst_60 = arith.constant 1.000000e+00 : f32
    %225 = vector.broadcast %cst_60 : f32 to vector<8x128xf32>
    %226 = arith.addf %219, %225 : vector<8x128xf32>
    %227 = tpu.reciprocal %224 {approx = true} : vector<8x128xf32> -> vector<8x128xf32>
    %228 = arith.mulf %226, %227 : vector<8x128xf32>
    %cst_61 = arith.constant 1.000000e+00 : f32
    %229 = vector.broadcast %cst_61 : f32 to vector<8x128xf32>
    %230 = arith.subf %229, %228 : vector<8x128xf32>
    %cst_62 = arith.constant 2.000000e+00 : f32
    %231 = vector.broadcast %cst_62 : f32 to vector<8x128xf32>
    %232 = arith.mulf %231, %44 : vector<8x128xf32>
    %cst_63 = arith.constant 5.000000e+00 : f32
    %233 = vector.broadcast %cst_63 : f32 to vector<8x128xf32>
    %234 = arith.mulf %233, %73 : vector<8x128xf32>
    %235 = arith.addf %232, %234 : vector<8x128xf32>
    %cst_64 = arith.constant 2.000000e+00 : f32
    %236 = vector.broadcast %cst_64 : f32 to vector<8x128xf32>
    %237 = arith.mulf %236, %173 : vector<8x128xf32>
    %238 = arith.addf %235, %237 : vector<8x128xf32>
    %cst_65 = arith.constant 1.562500e-01 : f32
    %239 = vector.broadcast %cst_65 : f32 to vector<8x128xf32>
    %240 = arith.mulf %239, %216 : vector<8x128xf32>
    %241 = arith.addf %238, %240 : vector<8x128xf32>
    %cst_66 = arith.constant 5.000000e+00 : f32
    %242 = vector.broadcast %cst_66 : f32 to vector<8x128xf32>
    %243 = arith.mulf %242, %230 : vector<8x128xf32>
    %244 = arith.addf %241, %243 : vector<8x128xf32>
    %c0_67 = arith.constant 0 : index
    %c0_68 = arith.constant 0 : index
    %c0_69 = arith.constant 0 : index
    %245 = vector.load %arg9[%c0_67, %c0_68, %c0_69] : memref<1x8x128xf32, #tpu.memory_space<vmem>>, vector<1x8x128xf32>
    %246 = vector.shape_cast %245 : vector<1x8x128xf32> to vector<8x128xf32>
    %247 = vector.shape_cast %244 : vector<8x128xf32> to vector<1x8x128xf32>
    tpu.vector_store %arg9[%c0_67, %c0_68, %c0_69], %247 {strides = array<i32>} : memref<1x8x128xf32, #tpu.memory_space<vmem>>, vector<1x8x128xf32>,
    return
  }
  func.func @transform_0(%arg0: i32, %arg1: i32) -> (i32, i32, i32) {
    %c0_i32 = arith.constant 0 : i32
    %c0_i32_0 = arith.constant 0 : i32
    return %arg0, %arg1, %c0_i32 : i32, i32, i32
  }
  func.func @transform_1(%arg0: i32, %arg1: i32) -> (i32, i32, i32) {
    %c0_i32 = arith.constant 0 : i32
    %c0_i32_0 = arith.constant 0 : i32
    %c0_i32_1 = arith.constant 0 : i32
    return %arg0, %c0_i32, %c0_i32_0 : i32, i32, i32
  }
  func.func @transform_2(%arg0: i32, %arg1: i32) -> (i32, i32, i32) {
    %c0_i32 = arith.constant 0 : i32
    %c0_i32_0 = arith.constant 0 : i32
    return %arg0, %arg1, %c0_i32 : i32, i32, i32
  }
  func.func @transform_3(%arg0: i32, %arg1: i32) -> (i32, i32, i32) {
    %c0_i32 = arith.constant 0 : i32
    %c0_i32_0 = arith.constant 0 : i32
    %c0_i32_1 = arith.constant 0 : i32
    return %arg0, %c0_i32, %c0_i32_0 : i32, i32, i32
  }
  func.func @transform_4(%arg0: i32, %arg1: i32) -> (i32, i32, i32) {
    %c0_i32 = arith.constant 0 : i32
    %c0_i32_0 = arith.constant 0 : i32
    return %arg0, %arg1, %c0_i32 : i32, i32, i32
  }
  func.func @transform_5(%arg0: i32, %arg1: i32) -> (i32, i32, i32) {
    %c0_i32 = arith.constant 0 : i32
    %c0_i32_0 = arith.constant 0 : i32
    %c0_i32_1 = arith.constant 0 : i32
    return %arg0, %c0_i32, %c0_i32_0 : i32, i32, i32
  }
  func.func @transform_6(%arg0: i32, %arg1: i32) -> (i32, i32, i32) {
    %c0_i32 = arith.constant 0 : i32
    %c0_i32_0 = arith.constant 0 : i32
    %c0_i32_1 = arith.constant 0 : i32
    return %arg0, %c0_i32, %c0_i32_0 : i32, i32, i32
  }
  func.func @transform_7(%arg0: i32, %arg1: i32) -> (i32, i32, i32) {
    %c0_i32 = arith.constant 0 : i32
    %c0_i32_0 = arith.constant 0 : i32
    return %arg0, %arg1, %c0_i32 : i32, i32, i32
  }
}

</mosaic_0001>

<bundles_post_ra>
// kernel: tpu_custom_call.1
= control target key start
LH: loop header
LB: loop body
LE: loop exit
PB: predicated region body
PF: predicated region fallthrough
CT: control target
= control target key end

     0   :  { %12 = vsyncpa [#allocation3], 0  ;;  %s1611_s0 = inlined_call_operand.vmem [shape: f32[2,8,16], index: 0, kind: input, shape index: {}]   ;;  %s1612_s1 = inlined_call_operand.vmem [shape: bf16[2,128,16], index: 1, kind: input, shape index: {}]   ;;  %s1613_s2 = inlined_call_operand.vmem [shape: f32[2,8,4], index: 2, kind: input, shape index: {}]   ;;  %s1614_s3 = inlined_call_operand.vmem [shape: f32[2,4,128], index: 3, kind: input, shape index: {}]   ;;  %s1615_s4 = inlined_call_operand.vmem [shape: bf16[2,8,32], index: 4, kind: input, shape index: {}]   ;;  %s1616_s5 = inlined_call_operand.vmem [shape: bf16[2,128,32], index: 5, kind: input, shape index: {}]   ;;  %s1617_s6 = inlined_call_operand.vmem [shape: f32[2,1,128], index: 6, kind: input, shape index: {}]   ;;  %s1618_s7 = inlined_call_operand.hbm [shape: f32[2,8,128], index: 7, kind: output, shape index: {}]  }
   0x1   :  { %14 = vsyncpa [#allocation3 + $0x1], 0  ;;  %s1395_s24 = smov 0   ;;  %s1397_s25 = smov 0  }
   0x2   :  { %s1399_s26 = smov 0   ;;  %s1401_s27 = smov 0  }
   0x3   :  { %s1403_s28 = smov 0   ;;  %s1405_s29 = smov 0  }
   0x4 LB: > { %s1062_s30 = sadd.s32 4294967295, %s1344_s29   ;;  %s1063_s8 = sadd.s32 4294967294, %s1344_s29   ;;  %s1344_s29 = sphi %s1405_s29, %s20_s29   ;;  %s1340_s28 = sphi %s1403_s28, %s1625_s28   ;;  %s1336_s27 = sphi %s1401_s27, %s1624_s27   ;;  %s1332_s26 = sphi %s1399_s26, %s1623_s26   ;;  %s1328_s25 = sphi %s1397_s25, %s1622_s25   ;;  %s1324_s24 = sphi %s1395_s24, %s1621_s24  }
   0x5   : > { %s32_s9 = sadd.s32 1, %s1340_s28  ;;  %s229_s10 = sadd.s32 1, %s1332_s26 }
   0x6   : > { %p34_p0 = scmp.ge.s32.totalorder %s32_s9, 2  ;;  %p239_p1 = scmp.ne.s32.totalorder %s1332_s26, %s1328_s25 }
   0x7   : > { %p240_p2 = scmp.eq.s32.totalorder %s1062_s30, 1  ;;  %p245_p3 = scmp.ne.s32.totalorder %s1328_s25, %s1324_s24 }
   0x8   : > { %s1627_s9 = smov (%p34_p0, %s32_s9), 0  ;;  %p246_p5 = scmp.eq.s32.totalorder %s1063_s8, 1 }
   0x9   : > { %p1435_p4 = por %p240_p2, %p239_p1  ;;  %s224_s12 = ssub.s32 %s1340_s28, %s1627_s9 }
   0xa   : > { %p1066_p6 = scmp.ge.s32.totalorder %s1344_s29, 1  ;;  %p227_p7 = scmp.eq.s32.totalorder %s224_s12, 0 }
   0xb   : > { %p1442_p8 = por %p246_p5, %p245_p3  ;;  %p323_p9 = scmp.lt.s32.totalorder %s1344_s29, 3 }
   0xc   : > { %s1448_s14 = scalar_select %p227_p7, %s1332_s26, %s229_s10  }
   0xd   : > { %p324_p10 = pnand %p1066_p6, %p323_p9 }
   0xe   : > { %p388_p11 = scmp.lt.s32.totalorder (!%p324_p10), %s1336_s27, 1  ;;  %s1349_s21 = smov (!%p324_p10), 126  }
   0xf   : > { %327 = sbr.rel (%p324_p10) target bundleno = 463 (0x1cf), region = 48  ;;  %s1354_s12 = smov (!%p324_p10), [#allocation2]  }
  0x10   : > { %s1272_s18 = sshll.u32 (!%p324_p10), %s1354_s12, 4  ;;  %s1273_s18 = int_to_ptr.vmem [resolvable:$false] %s1272_s18 }
  0x14   : > { %v1346_v0 = vmov 0.0   ;;  %v1347_v1 = vmov 0   ;;  %s1454_s15 = scalar_select %p388_p11, %s1336_s27, 1  ;;  %v1348_v2 = vmov 1   ;;  %vm528_vm0 = vcmask 130048  }
  0x15   : > { %1120 = vmatprep.subr.bf16.mxu0 %v1346_v0  ;;  %1223 = vset.pattern.permute.xlu1 %v1347_v1  ;;  %vm761_vm1 = vcmask 261120   ;;  %vm1350_vm2 = vmmov 0  }
  0x16   : > { %1140 = vmatprep.subr.bf16.mxu1 %v1346_v0  ;;  %1224 = vset.pattern.permute.xlu0 %v1348_v2  ;;  %s1068_s16 = sshll.u32 %s1454_s15, 3  ;;  %s1100_s17 = sshll.u32 %s1454_s15, 6 }
  0x17   : > { %s1463_s20 = scalar_lea.vmem %s1612_s1, %s1100_s17  ;;  %s406_s23 = scalar_lea.vmem %s1613_s2, %s1068_s16  ;;  %1136 = vmatprep.mubr.msk.bf16.mxu0 %vm1350_vm2, %v1346_v0  ;;  %1156 = vmatprep.mubr.msk.bf16.mxu1 %vm1350_vm2, %v1346_v0 }
  0x18   : > { %v1468_v3 = vld [vmem:[%s406_s23] sm:$0xff]  ;;  %s394_s10 = scalar_lea.vmem %s1611_s0, %s1068_s16  ;;  %v1232_v6 = vld [vmem:[%s1463_s20 + $0x38] sm:$0xff]   ;;  %s1478_s19 = scalar_lea.vmem %s1616_s5, %s1100_s17  ;;  %v1233_v9 = vld [vmem:[%s1463_s20 + $0x30] sm:$0xff]  }
  0x19   : > { %v641_v4 = vmul.f32 0.5, %v1468_v3  ;;  %v427_v5 = vld [vmem:[%s394_s10] sm:$0xff]  ;;  %v554_v8 = vsel %vm528_vm0, %v1232_v6, 0  ;;  %v1236_v10 = vld [vmem:[%s1478_s19 + $0x38] sm:$0xff]   ;;  %v551_v12 = vsel %vm528_vm0, %v1233_v9, 0  ;;  %v1238_v13 = vld [vmem:[%s1478_s19 + $0x30] sm:$0xff]  }
  0x1a   : > { %v1076_v7 = vmul.f32 -1.442695, %v427_v5  ;;  %1121 = vmatpush3.bf16.xpose.msra.mxu0 %v554_v8  ;;  %v834_v11 = vsel %vm761_vm1, %v1236_v10, 0  ;;  %v1234_v14 = vld [vmem:[%s1463_s20 + $0x28] sm:$0xff]   ;;  %v831_v15 = vsel %vm761_vm1, %v1238_v13, 0  ;;  %s1072_s16 = sshll.u32 %s1454_s15, 2 }
  0x1b   : > { %643 = vrot.lane.b32.xlu0 %v641_v4, %s1349_s21  ;;  %1122 = vmatprep.subr.bf16.mxu0 %v1346_v0  ;;  %v548_v17 = vsel %vm528_vm0, %v1234_v14, 0  ;;  %v1240_v18 = vld [vmem:[%s1478_s19 + $0x28] sm:$0xff]   ;;  %s417_s23 = scalar_lea.vmem %s1615_s4, %s1072_s16  ;;  %v1235_v22 = vld [vmem:[%s1463_s20 + $0x20] sm:$0xff]   ;;  %v1237_v29 = vld [vmem:[%s1463_s20 + $0x18] sm:$0xff]   ;;  %s410_s10 = scalar_lea.vmem %s1614_s3, %s1072_s16 }
  0x1c   : > { %1248 = vpow2.f32 %v1076_v7  ;;  %1141 = vmatpush3.bf16.xpose.msra.mxu1 %v834_v11  ;;  %v446_v20 = vld [vmem:[%s417_s23] sm:$0xf]  ;;  %v828_v23 = vsel %vm761_vm1, %v1240_v18, 0  ;;  %v545_v26 = vsel %vm528_vm0, %v1235_v22, 0  ;;  %v542_v32 = vsel %vm528_vm0, %v1237_v29, 0  ;;  %v1244_v33 = vld [vmem:[%s1478_s19 + $0x18] sm:$0xff]  }
  0x1d   : > { %1142 = vmatprep.subr.bf16.mxu1 %v1346_v0  ;;  %v1502_v21 = vunpack.c.l.bf16 %v446_v20  ;;  %v1242_v27 = vld [vmem:[%s1478_s19 + $0x20] sm:$0xff]   ;;  %v1239_v37 = vld [vmem:[%s1463_s20 + $0x10] sm:$0xff]   ;;  %v822_v38 = vsel %vm761_vm1, %v1244_v33, 0  ;;  %v1241_v43 = vld [vmem:[%s1463_s20 + $0x8] sm:$0xff]   ;;  %s1097_s16 = sshll.u32 %s1336_s27, 7  ;;  %s1274_s27 = scalar_lea.vmem %s1273_s18, 256 }
  0x1e   : > { %v825_v30 = vsel %vm761_vm1, %v1242_v27, 0  ;;  %v539_v40 = vsel %vm528_vm0, %v1239_v37, 0  ;;  %v1245_v41 = vld [vmem:[%s1478_s19 + $0x10] sm:$0xff]   ;;  %v536_v48 = vsel %vm528_vm0, %v1241_v43, 0  ;;  %v1246_v49 = vld [vmem:[%s1478_s19 + $0x8] sm:$0xff]   ;;  %v1243_v56 = vld [vmem:[%s1463_s20] sm:$0xff]   ;;  %s914_s30 = scalar_lea.hbm %s1618_s7, %s1097_s16 }
  0x1f   : > { %v737_v24 = vand.u32 2147483647, %v1502_v21  ;;  %v819_v44 = vsel %vm761_vm1, %v1245_v41, 0  ;;  %v816_v57 = vsel %vm761_vm1, %v1246_v49, 0  ;;  %v748_v60 = vsub.f32 0.0, %v1502_v21  ;;  %v1247_v4 = vld [vmem:[%s1478_s19] sm:$0xff]   ;;  %s425_s19 = scalar_lea.vmem %s1617_s6, %s1454_s15 }
  0x20   : > { %v533_v63 = vsel %vm528_vm0, %v1243_v56, 0  ;;  %vm743_vm3 = vcmp.ge.f32.partialorder %v1502_v21, 0.0  ;;  %v751_v5 = vmax.f32 %v1502_v21, 0.0  ;;  %s1351_s20 = smov 127   ;;  %s385_s15 = sand.u32 1, %s1328_s25  }
  0x21   : > { %v738_v25 = vsub.f32 0.0, %v737_v24  ;;  %v749_v10 = vmax.f32 %v748_v60, 0.0  ;;  %s1067_s21 = sshll.u32 %s385_s15, 3  ;;  %s902_s8 = scalar_lea.sflag [#allocation3], %s385_s15 }
  0x22   : > { %1123 = vmatpush3.bf16.xpose.msra.mxu0 %v551_v12  ;;  %v813_v12 = vsel %vm761_vm1, %v1247_v4, 0  ;;  %s387_s17 = scalar_lea.vmem [#allocation2], %s1067_s21 }
  0x23   : > { %1124 = vmatprep.subr.bf16.mxu0 %v1346_v0  ;;  %v739_v28 = vmul.f32 1.442695, %v738_v25  ;;  %s916_s22 = sshll.u32 %s387_s17, 4  ;;  %s917_s22 = int_to_ptr.vmem [resolvable:$true] %s916_s22 }
  0x24   : > { %1143 = vmatpush3.bf16.xpose.msra.mxu1 %v831_v15  ;;  %p1275_p1 = scmp.lt.s32.totalorder %s917_s22, %s1273_s18 }
  0x25   : > { %1144 = vmatprep.subr.bf16.mxu1 %v1346_v0 }
  0x29   : > { %v1249_v16 = vpop.eup %1248 }
  0x2a   : > { %v468_v19 = vadd.f32 1.0, %v1249_v16  ;;  %1125 = vmatpush3.bf16.xpose.msra.mxu0 %v548_v17 }
  0x2b   : > { %1126 = vmatprep.subr.bf16.mxu0 %v1346_v0 }
  0x2c   : > { %1250 = vrcp.f32 %v468_v19  ;;  %1145 = vmatpush3.bf16.xpose.msra.mxu1 %v828_v23 }
  0x2d   : > { %1146 = vmatprep.subr.bf16.mxu1 %v1346_v0  ;;  %1252 = vpow2.f32 %v739_v28  ;;  %v1352_v28 = vmov 2  }
  0x32   : > { %1127 = vmatpush3.bf16.xpose.msra.mxu0 %v545_v26 }
  0x33   : > { %1128 = vmatprep.subr.bf16.mxu0 %v1346_v0 }
  0x34   : > { %1147 = vmatpush3.bf16.xpose.msra.mxu1 %v825_v30 }
  0x35   : > { %1148 = vmatprep.subr.bf16.mxu1 %v1346_v0 }
  0x39   : > { %v1251_v31 = vpop.eup %1250 }
  0x3a   : > { %v473_v34 = vsub.f32 1.0, %v1251_v31  ;;  %v481_v35 = vadd.f32 1e-08, %v1251_v31  ;;  %1129 = vmatpush3.bf16.xpose.msra.mxu0 %v542_v32  ;;  %v1253_v39 = vpop.eup %1252  ;;  %v471_v46 = vmul.f32 %v1251_v31, %v1251_v31  ;;  %v1353_v32 = vmov 3  }
  0x3b   : > { %1130 = vmatprep.subr.bf16.mxu0 %v1346_v0  ;;  %v741_v42 = vadd.f32 1.0, %v1253_v39 }
  0x3c   : > { %v474_v36 = vadd.f32 1e-08, %v473_v34  ;;  %1254 = vlog2.f32 %v481_v35  ;;  %1149 = vmatpush3.bf16.xpose.msra.mxu1 %v822_v38  ;;  %v479_v45 = vmul.f32 %v473_v34, %v473_v34  ;;  %v472_v53 = vmul.f32 0.75, %v471_v46 }
  0x3d   : > { %1150 = vmatprep.subr.bf16.mxu1 %v1346_v0 }
  0x3e   : > { %1256 = vlog2.f32 %v474_v36  ;;  %v480_v52 = vmul.f32 0.25, %v479_v45 }
  0x3f   : > { %1258 = vrcp.f32 %v741_v42 }
  0x40   : > { %1260 = vlog2.f32 %v741_v42 }
  0x42   : > { %1131 = vmatpush3.bf16.xpose.msra.mxu0 %v539_v40 }
  0x43   : > { %1132 = vmatprep.subr.bf16.mxu0 %v1346_v0 }
  0x44   : > { %1151 = vmatpush3.bf16.xpose.msra.mxu1 %v819_v44  ;;  %v601_v44 = vlaneseq }
  0x45   : > { %1152 = vmatprep.subr.bf16.mxu1 %v1346_v0 }
  0x49   : > { %v1255_v47 = vpop.eup %1254 }
  0x4a   : > { %v483_v50 = vmul.f32 0.6931472, %v1255_v47  ;;  %1133 = vmatpush3.bf16.xpose.msra.mxu0 %v536_v48  ;;  %v602_v47 = vshrl.u32 %v601_v44, 7 }
  0x4b   : > { %v1257_v51 = vpop.eup %1256  ;;  %1134 = vmatprep.subr.bf16.mxu0 %v1346_v0 }
  0x4c   : > { %v476_v54 = vmul.f32 0.6931472, %v1257_v51  ;;  %v484_v55 = vsub.f32 0.0, %v483_v50  ;;  %1153 = vmatpush3.bf16.xpose.msra.mxu1 %v816_v57  ;;  %v1259_v62 = vpop.eup %1258  ;;  %v614_v50 = vsub.s32 1, %v602_v47 }
  0x4d   : > { %1154 = vmatprep.subr.bf16.mxu1 %v1346_v0  ;;  %v1261_v6 = vpop.eup %1260  ;;  %v744_v7 = vmul.f32 %v1259_v62, %v1253_v39 }
  0x4e   : > { %v477_v58 = vsub.f32 0.0, %v476_v54  ;;  %v485_v59 = vmul.f32 %v484_v55, %v480_v52  ;;  %v747_v9 = vmul.f32 0.6931472, %v1261_v6  ;;  %v603_v52 = vsub.s32 0, %v602_v47 }
  0x4f   : > { %v745_v11 = vsel %vm743_vm3, %v1259_v62, %v744_v7 }
  0x50   : > { %v478_v61 = vmul.f32 %v477_v58, %v472_v53  ;;  %v752_v13 = vadd.f32 %v751_v5, %v747_v9  ;;  %v753_v14 = vsub.f32 1.0, %v745_v11  ;;  %v757_v15 = vmul.f32 %v745_v11, %v745_v11 }
  0x51   : > { %v750_v17 = vadd.f32 %v749_v10, %v747_v9  ;;  %v765_v29 = vsel %vm761_vm1, %v745_v11, 0.0 }
  0x52   : > { %v486_v8 = vsub.f32 %v485_v59, %v478_v61  ;;  %1135 = vmatpush3.bf16.xpose.msra.mxu0 %v533_v63  ;;  %v754_v0 = vmul.f32 %v753_v14, %v753_v14  ;;  %v758_v18 = vmul.f32 0.75, %v757_v15 }
  0x54   : > { %v487_v16 = vpack.c.bf16 %v486_v8, %v486_v8  ;;  %1155 = vmatpush3.bf16.xpose.msra.mxu1 %v813_v12  ;;  %v755_v19 = vmul.f32 0.25, %v754_v0  ;;  %v759_v20 = vmul.f32 %v758_v18, %v752_v13 }
  0x56   : > { %v756_v21 = vmul.f32 %v755_v19, %v750_v17  ;;  %v762_v39 = vsel %vm761_vm1, %v759_v20, 0.0 }
  0x58   : > { %v760_v22 = vsub.f32 %v756_v21, %v759_v20 }
  0x59   : > { %1137 = vmatmul.mubr.msk.bf16.vlgmr.msra.gmra.mxu0 %vm528_vm0, %v487_v16 }
  0x5a   : > { %v768_v23 = vpack.c.bf16 %v745_v11, %v760_v22 }
  0x5c   : > { %1157 = vmatmul.mubr.msk.bf16.vlgmr.msra.gmra.mxu1 %vm761_vm1, %v768_v23 }
  0x8d   : > { %v644_v24 = vpop.permute.xlu0 %643 }
  0x8e   : > { %v646_v25 = vsub.f32 %v1468_v3, %v644_v24  ;;  %v647_v26 = vadd.f32 %v644_v24, %v1468_v3  ;;  %v1095_v24 = vld [vmem:[%s425_s19] ss:$0 sm:$0xff] }
  0x90   : > { %667 = vperm.xlu1 %1223, %v647_v26   ;;  %v654_v27 = vsub.f32 %v647_v26, %v646_v25 }
  0x92   : > { %656 = vrot.lane.b32.xlu0 %v654_v27, %s1351_s20 }
  0x94   : > { %677 = vperm.xlu1 %1223, %v646_v25  }
  0x96   : > { %688 = vperm.xlu0 %1224, %v647_v26  }
  0x98   : > { %1225 = vset.pattern.permute.xlu1 %v1348_v2 }
  0x99   : > { %697 = vperm.xlu1 %1225, %v646_v25  }
  0x9a   : > { %1231 = vset.pattern.permute.xlu0 %v1347_v1 }
  0x9d   : > { %1226 = vset.pattern.permute.xlu1 %v1347_v1 }
  0x9e   : > { %598 = vperm.xlu1 %1226, %v1468_v3  }
  0xa2   : > { %1227 = vset.pattern.permute.xlu1 %v1348_v2 }
  0xa3   : > { %609 = vperm.xlu1 %1227, %v1468_v3  }
  0xa7   : > { %1228 = vset.pattern.permute.xlu1 %v1352_v28 }
  0xa8   : > { %620 = vperm.xlu1 %1228, %v1468_v3  }
  0xac   : > { %1229 = vset.pattern.permute.xlu1 %v1347_v1 }
  0xb5   : > { %766 = vadd.xlane.f32.xlu0 %v765_v29 }
 0x104   : > { %v657_v30 = vpop.permute.xlu0 %656 }
 0x105   : > { %v659_v31 = vmul.f32 %v657_v30, %v654_v27  ;;  %v625_v30 = vsub.s32 2, %v602_v47 }
 0x107   : > { %710 = vperm.xlu1 %1229, %v659_v31   ;;  %v636_v31 = vsub.s32 3, %v602_v47 }
 0x10b   : > { %1230 = vset.pattern.permute.xlu1 %v1353_v32  ;;  %v668_v40 = vpop.permute.xlu1 %667 }
 0x10c   : > { %631 = vperm.xlu1 %1230, %v1468_v3   ;;  %v445_v3 = vld [vmem:[%s410_s10] sm:$0xf]  ;;  %s1268_s10 = scalar_lea.vmem %s917_s22, 128 }
 0x10d   : > { %v648_v42 = vmul.f32 0.5, %v445_v3  ;;  %v604_v28 = vrot.slane %v445_v3, %v603_v52  ;;  %v615_v29 = vrot.slane %v445_v3, %v614_v50  ;;  %p1269_p12 = scmp.ne.s32.totalorder %s917_s22, %s1268_s10  ;;  %p1276_p2 = scmp.lt.s32.totalorder %s1274_s27, %s1268_s10 }
 0x10f   : > { %v678_v41 = vpop.permute.xlu1 %677  ;;  %v650_v45 = vrot.slane %v648_v42, 2  ;;  %p1270_p13 = pnand %p1269_p12, %p1435_p4  ;;  %p1277_p3 = por %p1276_p2, %p1275_p1 }
 0x111   : > { %v653_v48 = vadd.f32 %v650_v45, %v445_v3  ;;  %v652_v49 = vsub.f32 %v445_v3, %v650_v45  ;;  %v689_v58 = vpop.permute.xlu0 %688  ;;  %p1271_p0 = pneg %p1270_p13 }
 0x113   : > { %v660_v51 = vsub.f32 %v653_v48, %v652_v49  ;;  %v703_v53 = vrot.slane %v652_v49, %v614_v50  ;;  %v683_v55 = vrot.slane %v652_v49, %v603_v52  ;;  %v694_v56 = vrot.slane %v653_v48, %v614_v50  ;;  %p1278_p5 = pnand %p1277_p3, %p1271_p0 }
 0x114   : > { %v698_v43 = vpop.permute.xlu1 %697  ;;  %v673_v59 = vrot.slane %v653_v48, %v603_v52 }
 0x115   : > { %v662_v57 = vrot.slane %v660_v51, 1  ;;  %v704_v60 = vmax.f32 %v698_v43, %v703_v53  ;;  %v684_v61 = vmax.f32 %v678_v41, %v683_v55  ;;  %v695_v62 = vmin.f32 %v689_v58, %v694_v56 }
 0x116   : > { %v674_v5 = vmin.f32 %v668_v40, %v673_v59  ;;  %v727_v8 = vmin.f32 %v698_v43, %v703_v53  ;;  %v723_v11 = vmin.f32 %v678_v41, %v683_v55  ;;  %v726_v12 = vmax.f32 %v689_v58, %v694_v56 }
 0x117   : > { %v664_v63 = vmul.f32 %v662_v57, %v660_v51  ;;  %v705_v6 = vsub.f32 %v695_v62, %v704_v60  ;;  %v722_v14 = vmax.f32 %v668_v40, %v673_v59 }
 0x118   : > { %v685_v7 = vsub.f32 %v674_v5, %v684_v61  ;;  %v728_v16 = vsub.f32 %v726_v12, %v727_v8 }
 0x119   : > { %v1553_v2 = vpop.f32.mrf.mxu0  ;;  %v599_v46 = vpop.permute.xlu1 %598  ;;  %v716_v9 = vrot.slane %v664_v63, %v603_v52  ;;  %v706_v13 = vmax.f32 %v705_v6, 0.0  ;;  %v724_v0 = vsub.f32 %v722_v14, %v723_v11 }
 0x11a   : > { %v686_v15 = vmax.f32 %v685_v7, 0.0  ;;  %v729_v19 = vmax.f32 %v728_v16, 0.0  ;;  %v891_v58 = vmul.f32 2.0, %v1553_v2 }
 0x11b   : > { %v1138_v33 = vpop.f32.mrf.mxu0  ;;  %v725_v21 = vmax.f32 %v724_v0, 0.0 }
 0x11c   : > { %v1555_v35 = vpop.f32.mrf.mxu1  ;;  %v707_v18 = vmul.f32 %v706_v13, %v686_v15  ;;  %v605_v33 = vsub.f32 %v599_v46, %v604_v28 }
 0x11d   : > { %v593_v34 = vpop.f32.mrf.mxu0  ;;  %v730_v22 = vmul.f32 %v729_v19, %v725_v21 }
 0x11e   : > { %v1158_v37 = vpop.f32.mrf.mxu1  ;;  %v610_v54 = vpop.permute.xlu1 %609 }
 0x11f   : > { %v1139_v36 = vpop.f32.mrf.mxu0  ;;  %v732_v26 = vadd.f32 1e-08, %v730_v22  ;;  %v616_v34 = vsub.f32 %v610_v54, %v615_v29  ;;  %v637_v37 = vrot.slane %v445_v3, %v636_v31 }
 0x120   : > { %v1557_v1 = vpop.f32.mrf.mxu1  ;;  %v626_v36 = vrot.slane %v445_v3, %v625_v30 }
 0x121   : > { %v617_v40 = vand.u32 2147483647, %v616_v34  ;;  %v878_v46 = vmul.f32 2.0, %v1557_v1 }
 0x122   : > { %v1159_v38 = vpop.f32.mrf.mxu1 }
 0x123   : > { %v621_v4 = vpop.permute.xlu1 %620  ;;  %v887_v54 = vadd.f32 1.0, %v878_v46 }
 0x124   : > { %v627_v41 = vsub.f32 %v621_v4, %v626_v36 }
 0x126   : > { %v628_v48 = vand.u32 2147483647, %v627_v41 }
 0x130   : > { %763 = vadd.xlane.f32.xlu1 %v762_v39  ;;  %v606_v39 = vand.u32 2147483647, %v605_v33 }
 0x132   : > { %v618_v45 = vadd.f32 %v617_v40, %v606_v39 }
 0x134   : > { %v629_v52 = vadd.f32 %v628_v48, %v618_v45 }
 0x13e   : > { %v767_v25 = vpop.xlane.xlu0 %766 }
 0x13f   : > { %v885_v27 = vadd.f32 %v1095_v24, %v767_v25 }
 0x141   : > { %v886_v32 = vadd.f32 1.0, %v885_v27 }
 0x182   : > { %v711_v10 = vpop.permute.xlu1 %710 }
 0x183   : > { %v717_v17 = vadd.f32 %v716_v9, %v711_v10 }
 0x185   : > { %v718_v20 = vsub.f32 %v717_v17, %v707_v18 }
 0x187   : > { %v719_v23 = vadd.f32 1e-08, %v718_v20  ;;  %v632_v38 = vpop.permute.xlu1 %631  ;;  %v731_v43 = vsub.f32 %v730_v22, %v718_v20 }
 0x188   : > { %v638_v44 = vsub.f32 %v632_v38, %v637_v37 }
 0x189   : > { %1262 = vrcp.f32 %v719_v23 }
 0x18a   : > { %1264 = vrcp.f32 %v732_v26  ;;  %v639_v47 = vand.u32 2147483647, %v638_v44 }
 0x18b   : > { %1266 = vrcp.f32 %v886_v32 }
 0x18c   : > { %v640_v3 = vadd.f32 %v639_v47, %v629_v52 }
 0x18e   : > { %v892_v57 = vmul.f32 5.0, %v640_v3 }
 0x190   : > { %v893_v62 = vadd.f32 %v892_v57, %v891_v58 }
 0x196   : > { %v1263_v42 = vpop.eup %1262 }
 0x197   : > { %v721_v49 = vmul.f32 %v1263_v42, %v707_v18  ;;  %v1265_v50 = vpop.eup %1264 }
 0x198   : > { %v734_v51 = vmul.f32 %v1265_v50, %v731_v43  ;;  %v1267_v55 = vpop.eup %1266 }
 0x199   : > { %v889_v59 = vmul.f32 %v1267_v55, %v887_v54 }
 0x19a   : > { %v735_v53 = vsub.f32 %v721_v49, %v734_v51 }
 0x19b   : > { %v890_v63 = vsub.f32 1.0, %v889_v59 }
 0x19c   : > { %v736_v56 = vsub.f32 0.0, %v735_v53 }
 0x19d   : > { %v898_v6 = vmul.f32 5.0, %v890_v63 }
 0x19e   : > { %v894_v60 = vmul.f32 2.0, %v736_v56 }
 0x1a0   : > { %v895_v4 = vadd.f32 %v894_v60, %v893_v62 }
 0x1b9   : > { %v764_v61 = vpop.xlane.xlu1 %763 }
 0x1ba   : > { %v877_v1 = vadd.f32 %v1555_v35, %v764_v61 }
 0x1bc   : > { %v896_v5 = vmul.f32 0.15625, %v877_v1 }
 0x1be   : > { %v897_v7 = vadd.f32 %v896_v5, %v895_v4 }
 0x1c0   : > { %v899_v8 = vadd.f32 %v898_v6, %v897_v7 }
 0x1c2   : > { %900 = vst [vmem:[%s387_s17] sm:$0xff] %v899_v8 }
 0x1c3   : > { %1281 = shalt.err (!%p1278_p5)
}
 0x1c4   : > { %s1282_s19 = scalar_lea.hbm %s914_s30, 128  ;;  %s1286_s16 = scalar_lea.hbm %s1618_s7, 256 }
 0x1c5   : > { %p1283_p6 = scmp.ne.s32.totalorder %s914_s30, %s1282_s19  ;;  %p1287_p10 = scmp.lt.s32.totalorder %s914_s30, %s1618_s7 }
 0x1c6   : > { %p1288_p11 = scmp.lt.s32.totalorder %s1286_s16, %s1282_s19 }
 0x1c7   : > { %p1284_p7 = pnand %p1283_p6, %p1435_p4 }
 0x1c8   : > { %p1289_p12 = por %p1288_p11, %p1287_p10 }
 0x1c9   : > { %p1285_p9 = pneg %p1284_p7 }
 0x1cb   : > { %p1290_p13 = pnand %p1289_p12, %p1285_p9 }
 0x1cd   : > { %1293 = shalt.err (!%p1290_p13)
}
 0x1ce   : > { %1160 = dma.vmem_to_hbm [thread:$0]  (%p1435_p4), %s917_s22, 128, %s914_s30, %s902_s8  }
 0x1cf PF: > { %p1166_p0 = scmp.ge.s32.totalorder %s1344_s29, 2  ;;  %s928_s20 = sand.u32 1, %s1324_s24  }
 0x1d0   : > { %s929_s10 = scalar_lea.sflag [#allocation3], %s928_s20 }
 0x1d1   : > { %p1163_p1 = pnand %p1166_p0, %p1442_p8 }
 0x1d3   : > { %p1164_p2 = pneg %p1163_p1 }
 0x1d5   : > { %1319 = dma.done.wait (%p1164_p2), %s929_s10, 128  }
 0x1d6   : > { %1321 = vsyncadd (%p1164_p2), %s929_s10, 4294967168  ;;  %s20_s29 = sadd.s32 1, %s1344_s29   ;;  %s1621_s24 = smov %s1328_s25 }
 0x1d7   : > { %p17_p3 = scmp.ge.s32.totalorder %s20_s29, 4   ;;  %s1622_s25 = smov %s1332_s26 }
 0x1d8   : > { %s1623_s26 = smov %s1448_s14  ;;  %s1624_s27 = smov %s1340_s28 }
 0x1d9   : > { %s1625_s28 = smov %s1627_s9  ;;  %19 = sbr.rel (!%p17_p3) target bundleno = 4 (0x4), region = 101 }
 0x1de   :  { %934 = vsyncpa [#allocation3], 1 }
 0x1df   :  { %936 = vsyncpa [#allocation3 + $0x1], 1 }

</bundles_post_ra>
